<compile_context>
chip_gen: v7x
topology: tpu7x:2x2x1
jax: 0.10.0
libtpu: 0.0.40
codegen_flags: <defaults>
</compile_context>

<pallas_src>
import jax
import jax.numpy as jnp
from jax.experimental import pallas as pl
from jax.experimental.pallas import tpu as pltpu


def _round_up(a, b):
    return -(-a // b) * b


def _round_down(a, b):
    return (a // b) * b


_LN_CHUNK = 128  # row-slab size for chunked LayerNorm (bounds f32 temporaries)


def _make_kernel(*, eps, layer_norm, relu, cache_ln, chunk_ln, mxu_dtype):
    """Builds the fused LayerNorm -> Linear -> ReLU kernel body.

    Ref order:
      layer_norm: x, gamma, beta, w, b, o [, xn_scratch if cache_ln]
      else:       x, w, b, o
    """

    def kernel(*refs):
        if layer_norm:
            x_ref, gamma_ref, beta_ref, w_ref, b_ref, o_ref = refs[:6]
            xn_ref = refs[6] if cache_ln else None
        else:
            x_ref, w_ref, b_ref, o_ref = refs[:4]
            xn_ref = None

        j = pl.program_id(1)
        compute_dtype = x_ref.dtype if mxu_dtype is None else mxu_dtype

        def layer_norm_f32(xv):
            xf = xv.astype(jnp.float32)
            mean = jnp.mean(xf, axis=-1, keepdims=True)
            xc = xf - mean
            var = jnp.mean(xc * xc, axis=-1, keepdims=True)  # biased var (torch LayerNorm)
            xn = xc * jax.lax.rsqrt(var + eps)
            return (xn * gamma_ref[...].astype(jnp.float32)
                    + beta_ref[...].astype(jnp.float32))

        if layer_norm:
            if cache_ln:
                # NOTE: correctness of this cache relies on the D_out axis (grid axis 1)
                # being the INNERMOST grid axis and marked "arbitrary": the scratch
                # written at j == 0 is re-read for every j of the same row-tile i.
                @pl.when(j == 0)
                def _():
                    tm = x_ref.shape[0]
                    if chunk_ln:
                        def body(c, carry):
                            r = pl.multiple_of(c * _LN_CHUNK, _LN_CHUNK)
                            xn = layer_norm_f32(x_ref[pl.ds(r, _LN_CHUNK), :])
                            xn_ref[pl.ds(r, _LN_CHUNK), :] = xn.astype(xn_ref.dtype)
                            return carry
                        jax.lax.fori_loop(0, tm // _LN_CHUNK, body, 0, unroll=True)
                    else:
                        xn_ref[...] = layer_norm_f32(x_ref[...]).astype(xn_ref.dtype)

                lhs = xn_ref[...]
            else:
                lhs = layer_norm_f32(x_ref[...]).astype(compute_dtype)
        else:
            lhs = x_ref[...].astype(compute_dtype)

        # Narrow-dtype MXU operands, f32 accumulation.
        y = jnp.dot(lhs, w_ref[...], preferred_element_type=jnp.float32)
        y = y + b_ref[...].astype(jnp.float32)
        if relu:
            y = jnp.maximum(y, 0.0)
        o_ref[...] = y.astype(o_ref.dtype)

    return kernel


def linear_layer_forward(x, gamma, beta, weight, bias, *,
                         layer_norm=True, relu=True, eps=1e-5,
                         mxu_dtype=None, tile_m=None, tile_n=None):
    """Fused LayerNorm -> Dropout(eval: identity) -> Linear -> ReLU.

    x: (N, L, D_in); weight: (D_in, D_out); bias: (D_out,). Returns (N, L, D_out).
    mxu_dtype: optional narrower MXU operand dtype (e.g. jnp.bfloat16); accumulation
               stays f32. Big speedup on v5e, halves weight VMEM/HBM traffic everywhere.
    """
    N, L, D_in = x.shape
    D_out = weight.shape[1]
    M = N * L
    x_flat = x.reshape(M, D_in)

    # One-time weight cast (halves weight DMA and makes residency twice as likely).
    w = weight if mxu_dtype is None else weight.astype(mxu_dtype)
    b2 = bias.reshape(1, D_out)
    gamma2 = gamma.reshape(1, D_in)
    beta2 = beta.reshape(1, D_in)

    x_bytes = x_flat.dtype.itemsize
    w_bytes = w.dtype.itemsize
    o_bytes = x_bytes
    scratch_dtype = mxu_dtype if mxu_dtype is not None else x_flat.dtype
    s_bytes = jnp.dtype(scratch_dtype).itemsize

    # --- chip-aware VMEM budget (v5e/v6e: 128 MiB physical, v7x: 64 MiB per TC) ---
    try:
        phys_vmem = int(getattr(pltpu.get_tpu_info(), "vmem_capacity_bytes", 64 << 20))
    except Exception:
        phys_vmem = 64 << 20  # conservative fallback (v7x per-TC size)
    vmem_budget = min(int(phys_vmem * 0.85), 112 << 20)

    # --- D_out tiling: keep the whole weight resident in VMEM when it fits, so it is
    #     streamed from HBM exactly once instead of once per row-tile. ---
    if tile_n is None:
        if D_out <= 128 or 2 * D_in * D_out * w_bytes <= 0.4 * vmem_budget:
            tile_n = D_out
        else:
            tile_n = min(512, max(128, _round_down(D_out, 128)))
    else:
        tile_n = D_out if tile_n >= D_out else max(128, _round_down(tile_n, 128))
    num_j = pl.cdiv(D_out, tile_n)
    weight_resident = num_j == 1
    cache_ln = layer_norm and num_j > 1  # reuse LN result across D_out tiles

    # --- row tiling ---
    target_m = 1024 if tile_m is None else max(8, int(tile_m))

    def working_set(tm):
        ws = 2 * tm * D_in * x_bytes           # x tile, double-buffered
        ws += 2 * D_in * tile_n * w_bytes      # weight tile, double-buffered
        ws += 2 * tm * tile_n * o_bytes        # output tile, double-buffered
        ws += 2 * (2 * D_in + tile_n) * 4      # gamma / beta / bias
        if layer_norm:
            if cache_ln:
                ws += tm * D_in * s_bytes      # cached LN activations
            ln_rows = _LN_CHUNK if (cache_ln and tm % _LN_CHUNK == 0 and tm > _LN_CHUNK) else tm
            ws += 3 * ln_rows * D_in * 4       # LayerNorm f32 temporaries
        return ws

    if M <= target_m:
        if weight_resident and M >= 16:
            # Give megacore (v7x: 2 TCs share the "parallel" i axis) >= 2 row blocks.
            half = _round_up(pl.cdiv(M, 2), 8)
            tm = half if half < M else M
        else:
            tm = M
    else:
        tm = _round_down(target_m, 128) if target_m >= 128 else _round_down(target_m, 8)
        tm = max(tm, 8)
    # Shrink rows to fit the VMEM budget (matters for very large D_in, esp. on v7x).
    while tm > 8 and working_set(tm) > vmem_budget:
        nxt = max(8, _round_down(tm // 2, 8))
        if nxt == tm:
            break
        tm = nxt
    tile_m = tm
    num_i = pl.cdiv(M, tile_m)

    chunk_ln = cache_ln and tile_m % _LN_CHUNK == 0 and tile_m > _LN_CHUNK

    vmem_limit = int(min(max(working_set(tile_m) + (8 << 20), 32 << 20), vmem_budget))

    # Honest advisory cost: weight is re-streamed once per row-tile only when tiled.
    w_fetches = 1 if weight_resident else num_i
    cost = pl.CostEstimate(
        flops=2 * M * D_in * D_out,
        transcendentals=int(M) if layer_norm else 0,
        bytes_accessed=(M * D_in * x_bytes
                        + w_fetches * D_in * D_out * w_bytes
                        + M * D_out * o_bytes
                        + D_out * bias.dtype.itemsize
                        + (2 * D_in * gamma.dtype.itemsize if layer_norm else 0)))

    in_specs = [pl.BlockSpec((tile_m, D_in), lambda i, j: (i, 0))]
    operands = [x_flat]
    if layer_norm:
        in_specs += [pl.BlockSpec((1, D_in), lambda i, j: (0, 0)),
                     pl.BlockSpec((1, D_in), lambda i, j: (0, 0))]
        operands += [gamma2, beta2]
    in_specs += [pl.BlockSpec((D_in, tile_n), lambda i, j: (0, j)),
                 pl.BlockSpec((1, tile_n), lambda i, j: (0, j))]
    operands += [w, b2]

    scratch_shapes = []
    if cache_ln:
        scratch_shapes.append(pltpu.VMEM((tile_m, D_in), scratch_dtype))

    kernel = _make_kernel(eps=eps, layer_norm=layer_norm, relu=relu,
                          cache_ln=cache_ln, chunk_ln=chunk_ln, mxu_dtype=mxu_dtype)

    out_flat = pl.pallas_call(
        kernel,
        out_shape=jax.ShapeDtypeStruct((M, D_out), x.dtype),
        grid_spec=pltpu.PrefetchScalarGridSpec(
            num_scalar_prefetch=0,
            grid=(num_i, num_j),
            in_specs=in_specs,
            out_specs=pl.BlockSpec((tile_m, tile_n), lambda i, j: (i, j)),
            scratch_shapes=scratch_shapes,
        ),
        compiler_params=pltpu.CompilerParams(
            # i = rows ("parallel", sharded across TCs); j = D_out (innermost,
            # "arbitrary" so the LN scratch carried across it stays valid).
            dimension_semantics=("parallel", "arbitrary"),
            vmem_limit_bytes=vmem_limit),
        cost_estimate=cost,
    )(*operands)

    return out_flat.reshape(N, L, D_out)


def _reference(x, gamma, beta, weight, bias, *, layer_norm=True, relu=True, eps=1e-5):
    x = x.astype(jnp.float32)
    if layer_norm:
        mean = jnp.mean(x, axis=-1, keepdims=True)
        var = jnp.mean((x - mean) ** 2, axis=-1, keepdims=True)
        x = (x - mean) / jnp.sqrt(var + eps) * gamma + beta
    y = x @ weight + bias
    if relu:
        y = jnp.maximum(y, 0.0)
    return y


def _make_params(key, D_in, D_out):
    k_w, k_b, k_g, k_be = jax.random.split(key, 4)
    weight = jax.random.normal(k_w, (D_in, D_out), dtype=jnp.float32) * 0.05
    bias = jax.random.normal(k_b, (D_out,), dtype=jnp.float32) * 0.01
    gamma = 1.0 + 0.1 * jax.random.normal(k_g, (D_in,), dtype=jnp.float32)
    beta = 0.1 * jax.random.normal(k_be, (D_in,), dtype=jnp.float32)
    return weight, bias, gamma, beta


if __name__ == "__main__":
    keys = jax.random.split(jax.random.PRNGKey(0), 6)

    # 1) Default LinearLayer config (LayerNorm + Linear + ReLU), resident weight.
    N, L, D_in, D_out = 2, 8, 32, 32
    x = jax.random.normal(keys[0], (N, L, D_in), dtype=jnp.float32)
    weight, bias, gamma, beta = _make_params(keys[1], D_in, D_out)
    out = jax.block_until_ready(linear_layer_forward(x, gamma, beta, weight, bias))
    ref = _reference(x, gamma, beta, weight, bias)
    assert out.shape == (N, L, D_out)
    assert jnp.allclose(out, ref, atol=1e-4, rtol=1e-4), "mismatch (LN+ReLU, resident W)"

    # 2) Plain Linear (no LayerNorm, no ReLU).
    out2 = jax.block_until_ready(linear_layer_forward(
        x, gamma, beta, weight, bias, layer_norm=False, relu=False))
    ref2 = _reference(x, gamma, beta, weight, bias, layer_norm=False, relu=False)
    assert jnp.allclose(out2, ref2, atol=1e-4, rtol=1e-4), "mismatch (plain Linear)"

    # 3) Streamed-weight path (num_j > 1): exercises cached + chunked LayerNorm.
    N3, L3, D_in3, D_out3 = 2, 192, 64, 256
    x3 = jax.random.normal(keys[2], (N3, L3, D_in3), dtype=jnp.float32)
    w3, b3, g3, be3 = _make_params(keys[3], D_in3, D_out3)
    out3 = jax.block_until_ready(linear_layer_forward(x3, g3, be3, w3, b3, tile_n=128))
    ref3 = _reference(x3, g3, be3, w3, b3)
    assert jnp.allclose(out3, ref3, atol=1e-4, rtol=1e-4), "mismatch (LN cache path)"

    # 4) bf16 MXU operands (f32 accumulation) -- opt-in fast path.
    out4 = jax.block_until_ready(linear_layer_forward(
        x3, g3, be3, w3, b3, tile_n=128, mxu_dtype=jnp.bfloat16))
    assert jnp.allclose(out4, ref3, atol=6e-2, rtol=6e-2), "mismatch (bf16 MXU)"

    # 5) Ragged edges (no wrapper-side padding): M and D_out not tile multiples.
    N5, L5, D_in5, D_out5 = 3, 7, 32, 48
    x5 = jax.random.normal(keys[4], (N5, L5, D_in5), dtype=jnp.float32)
    w5, b5, g5, be5 = _make_params(keys[5], D_in5, D_out5)
    out5 = jax.block_until_ready(linear_layer_forward(x5, g5, be5, w5, b5))
    ref5 = _reference(x5, g5, be5, w5, b5)
    assert out5.shape == (N5, L5, D_out5)
    assert jnp.allclose(out5, ref5, atol=1e-4, rtol=1e-4), "mismatch (ragged edges)"

    print("KERNEL_OK")
</pallas_src>

<mosaic_0001>
module attributes {stable_mosaic.version = 11 : i64} {
  func.func @kernel(%arg0: i32, %arg1: i32, %arg2: memref<8x32xf32, #tpu.memory_space<vmem>>, %arg3: memref<1x32xf32, #tpu.memory_space<vmem>>, %arg4: memref<1x32xf32, #tpu.memory_space<vmem>>, %arg5: memref<32x32xf32, #tpu.memory_space<vmem>>, %arg6: memref<1x32xf32, #tpu.memory_space<vmem>>, %arg7: memref<8x32xf32, #tpu.memory_space<vmem>>) attributes {dimension_semantics = [#tpu.dimension_semantics<parallel>, #tpu.dimension_semantics<arbitrary>], iteration_bounds = array<i64: 2, 1>, scalar_prefetch = 0 : i64, scratch_operands = 0 : i64, tpu.core_type = #tpu.core_type<tc>, window_params = [{transform_indices = @transform_0, window_bounds = array<i64: 8, 32>}, {pipeline_mode = #tpu.pipeline_mode<synchronous>, transform_indices = @transform_1, window_bounds = array<i64: 1, 32>}, {pipeline_mode = #tpu.pipeline_mode<synchronous>, transform_indices = @transform_2, window_bounds = array<i64: 1, 32>}, {transform_indices = @transform_3, window_bounds = array<i64: 32, 32>}, {transform_indices = @transform_4, window_bounds = array<i64: 1, 32>}, {transform_indices = @transform_5, window_bounds = array<i64: 8, 32>}]} {
    %c0 = arith.constant 0 : index
    %c0_0 = arith.constant 0 : index
    %0 = vector.load %arg2[%c0, %c0_0] : memref<8x32xf32, #tpu.memory_space<vmem>>, vector<8x32xf32>
    %cst = arith.constant dense<0.000000e+00> : vector<8xf32>
    %1 = vector.multi_reduction <add>, %0, %cst [1] : vector<8x32xf32> to vector<8xf32>
    %2 = vector.shape_cast %1 : vector<8xf32> to vector<8x1xf32>
    %cst_1 = arith.constant 3.200000e+01 : f32
    %3 = vector.broadcast %cst_1 : f32 to vector<8x1xf32>
    %4 = arith.divf %2, %3 : vector<8x1xf32>
    %5 = vector.broadcast %4 : vector<8x1xf32> to vector<8x32xf32>
    %6 = arith.subf %0, %5 : vector<8x32xf32>
    %7 = arith.mulf %6, %6 : vector<8x32xf32>
    %cst_2 = arith.constant dense<0.000000e+00> : vector<8xf32>
    %8 = vector.multi_reduction <add>, %7, %cst_2 [1] : vector<8x32xf32> to vector<8xf32>
    %9 = vector.shape_cast %8 : vector<8xf32> to vector<8x1xf32>
    %cst_3 = arith.constant 3.200000e+01 : f32
    %10 = vector.broadcast %cst_3 : f32 to vector<8x1xf32>
    %11 = arith.divf %9, %10 : vector<8x1xf32>
    %cst_4 = arith.constant 9.99999974E-6 : f32
    %12 = vector.broadcast %cst_4 : f32 to vector<8x1xf32>
    %13 = arith.addf %11, %12 : vector<8x1xf32>
    %14 = math.rsqrt %13 : vector<8x1xf32>
    %15 = vector.broadcast %14 : vector<8x1xf32> to vector<8x32xf32>
    %16 = arith.mulf %6, %15 : vector<8x32xf32>
    %c0_5 = arith.constant 0 : index
    %c0_6 = arith.constant 0 : index
    %17 = vector.load %arg3[%c0_5, %c0_6] : memref<1x32xf32, #tpu.memory_space<vmem>>, vector<1x32xf32>
    %18 = vector.broadcast %17 : vector<1x32xf32> to vector<8x32xf32>
    %19 = arith.mulf %16, %18 : vector<8x32xf32>
    %c0_7 = arith.constant 0 : index
    %c0_8 = arith.constant 0 : index
    %20 = vector.load %arg4[%c0_7, %c0_8] : memref<1x32xf32, #tpu.memory_space<vmem>>, vector<1x32xf32>
    %21 = vector.broadcast %20 : vector<1x32xf32> to vector<8x32xf32>
    %22 = arith.addf %19, %21 : vector<8x32xf32>
    %c0_9 = arith.constant 0 : index
    %c0_10 = arith.constant 0 : index
    %23 = vector.load %arg5[%c0_9, %c0_10] : memref<32x32xf32, #tpu.memory_space<vmem>>, vector<32x32xf32>
    %cst_11 = arith.constant dense<0.000000e+00> : vector<8x32xf32>
    %24 = tpu.matmul %22, %23, %cst_11 {dimension_numbers = #tpu.dot_dimension_numbers<[1], [0], [0], [1], [0, 0, 1, 1], [], []>} : vector<8x32xf32>, vector<32x32xf32>, vector<8x32xf32> -> vector<8x32xf32>
    %c0_12 = arith.constant 0 : index
    %c0_13 = arith.constant 0 : index
    %25 = vector.load %arg6[%c0_12, %c0_13] : memref<1x32xf32, #tpu.memory_space<vmem>>, vector<1x32xf32>
    %26 = vector.broadcast %25 : vector<1x32xf32> to vector<8x32xf32>
    %27 = arith.addf %24, %26 : vector<8x32xf32>
    %cst_14 = arith.constant 0.000000e+00 : f32
    %28 = vector.broadcast %cst_14 : f32 to vector<8x32xf32>
    %29 = arith.maximumf %27, %28 : vector<8x32xf32>
    %c0_15 = arith.constant 0 : index
    %c0_16 = arith.constant 0 : index
    %30 = vector.load %arg7[%c0_15, %c0_16] : memref<8x32xf32, #tpu.memory_space<vmem>>, vector<8x32xf32>
    tpu.vector_store %arg7[%c0_15, %c0_16], %29 {strides = array<i32>} : memref<8x32xf32, #tpu.memory_space<vmem>>, vector<8x32xf32>,
    return
  }
  func.func @transform_0(%arg0: i32, %arg1: i32) -> (i32, i32) {
    %c0_i32 = arith.constant 0 : i32
    %c0_i32_0 = arith.constant 0 : i32
    return %arg0, %c0_i32 : i32, i32
  }
  func.func @transform_1(%arg0: i32, %arg1: i32) -> (i32, i32) {
    %c0_i32 = arith.constant 0 : i32
    %c0_i32_0 = arith.constant 0 : i32
    %c0_i32_1 = arith.constant 0 : i32
    return %c0_i32, %c0_i32_0 : i32, i32
  }
  func.func @transform_2(%arg0: i32, %arg1: i32) -> (i32, i32) {
    %c0_i32 = arith.constant 0 : i32
    %c0_i32_0 = arith.constant 0 : i32
    %c0_i32_1 = arith.constant 0 : i32
    return %c0_i32, %c0_i32_0 : i32, i32
  }
  func.func @transform_3(%arg0: i32, %arg1: i32) -> (i32, i32) {
    %c0_i32 = arith.constant 0 : i32
    %c0_i32_0 = arith.constant 0 : i32
    return %c0_i32, %arg1 : i32, i32
  }
  func.func @transform_4(%arg0: i32, %arg1: i32) -> (i32, i32) {
    %c0_i32 = arith.constant 0 : i32
    %c0_i32_0 = arith.constant 0 : i32
    return %c0_i32, %arg1 : i32, i32
  }
  func.func @transform_5(%arg0: i32, %arg1: i32) -> (i32, i32) {
    %c0_i32 = arith.constant 0 : i32
    return %arg0, %arg1 : i32, i32
  }
}

</mosaic_0001>

<bundles_post_ra>
// kernel: tpu_custom_call.1
= control target key start
LH: loop header
LB: loop body
LE: loop exit
PB: predicated region body
PF: predicated region fallthrough
CT: control target
= control target key end

     0   :  { %10 = vsyncpa [#allocation3], 0  ;;  %s1063_s0 = inlined_call_operand.hbm [shape: f32[16,32], index: 0, kind: input, shape index: {}]   ;;  %s1064_s1 = inlined_call_operand.vmem [shape: f32[1,32], index: 1, kind: input, shape index: {}]   ;;  %s1065_s2 = inlined_call_operand.vmem [shape: f32[1,32], index: 2, kind: input, shape index: {}]   ;;  %s1066_s3 = inlined_call_operand.hbm [shape: f32[32,32], index: 3, kind: input, shape index: {}]   ;;  %s1067_s4 = inlined_call_operand.vmem [shape: f32[1,32], index: 4, kind: input, shape index: {}]   ;;  %s1068_s5 = inlined_call_operand.hbm [shape: f32[16,32], index: 5, kind: output, shape index: {}]  }
   0x1   :  { %12 = vsyncpa [#allocation3 + $0x1], 0 }
   0x2   :  { %13 = vsyncpa [#allocation6], 0 }
   0x3   :  { %14 = vsyncpa [#allocation4], 0 }
   0x4   :  { %16 = vsyncpa [#allocation4 + $0x1], 0  ;;  %s832_s18 = smov 0   ;;  %s834_s19 = smov 0  }
   0x5   :  { %s836_s20 = smov 0   ;;  %s838_s21 = smov 0  }
   0x6   :  { %s840_s22 = smov 0   ;;  %s842_s23 = smov 0  }
   0x7 LB: > { %s526_s24 = sadd.s32 4294967295, %s792_s23   ;;  %s527_s25 = sadd.s32 4294967294, %s792_s23   ;;  %s792_s23 = sphi %s842_s23, %s22_s23   ;;  %s788_s22 = sphi %s840_s22, %s1092_s22   ;;  %s784_s21 = sphi %s838_s21, %s1091_s21   ;;  %s780_s20 = sphi %s836_s20, %s1090_s20   ;;  %s776_s19 = sphi %s834_s19, %s1089_s19   ;;  %s772_s18 = sphi %s832_s18, %s1088_s18  }
   0x8   : > { %p54_p0 = scmp.ne.s32.totalorder %s776_s19, %s772_s18  ;;  %p866_p1 = scmp.eq.s32.totalorder %s526_s24, 0 }
   0x9   : > { %p870_p2 = scmp.eq.s32.totalorder %s526_s24, 1  ;;  %p180_p3 = scmp.eq.s32.totalorder %s527_s25, 1 }
   0xa   : > { %s1073_s26 = scalar_select %p866_p1, 1, 0 }
   0xb   : > { %s1074_s27 = scalar_select %p870_p2, 1, 0 }
   0xc   : > { %p876_p4 = por %p866_p1, %p54_p0  ;;  %p528_p5 = scmp.ge.s32.totalorder %s792_s23, 1 }
   0xd   : > { %p881_p6 = por %p180_p3, %p54_p0  ;;  %p187_p7 = scmp.lt.s32.totalorder %s792_s23, 3 }
   0xe   : > { %s1075_s28 = scalar_select %p876_p4, 1, 0 }
   0xf   : > { %s1076_s29 = scalar_select %p881_p6, 1, 0 }
  0x10   : > { %p886_p8 = pnand %p528_p5, %p187_p7  ;;  %s794_s6 = smov [#allocation5]  }
  0x11   : > { %s207_s7 = sshll.u32 %s794_s6, 4  ;;  %s34_s9 = sadd.s32 1, %s788_s22  ;;  %s208_s7 = int_to_ptr.vmem [resolvable:$true] %s207_s7 }
  0x12   : > { %s1077_s30 = scalar_select %p886_p8, 1, 0 }
  0x13   : > { %p576_p9 = pneg %p886_p8  ;;  %s648_s12 = scalar_lea.hbm %s1066_s3, 512 }
  0x14   : > { %p649_p12 = scmp.ne.s32.totalorder %s1066_s3, %s648_s12  ;;  %p655_p5 = scmp.lt.u32.totalorder %s648_s12, %s1066_s3 }
  0x15   : > { %p895_p11 = pnand %p576_p9, %p866_p1 }
  0x17   : > { %p650_p13 = pneg %p895_p11 }
  0x19   : > { %p651_p0 = pnand %p650_p13, %p649_p12 }
  0x1b   : > { %p652_p3 = pneg %p651_p0 }
  0x1d   : > { %p657_p7 = pnand %p655_p5, %p652_p3 }
  0x1f   : > { %660 = shalt.err (!%p657_p7)
}
  0x20   : > { %s661_s17 = scalar_lea.vmem %s208_s7, 512  ;;  %p669_p1 = scmp.lt.s32.totalorder %s208_s7, %s208_s7 }
  0x21   : > { %p662_p9 = scmp.ne.s32.totalorder %s208_s7, %s661_s17  ;;  %p670_p4 = scmp.lt.s32.totalorder %s661_s17, %s661_s17 }
  0x23   : > { %p664_p10 = pnand %p662_p9, %p650_p13  ;;  %p671_p8 = por %p670_p4, %p669_p1 }
  0x25   : > { %p665_p6 = pneg %p664_p10 }
  0x27   : > { %p672_p2 = pnand %p671_p8, %p665_p6 }
  0x29   : > { %675 = shalt.err (!%p672_p2)
}
  0x2a   : > { %s795_s24 = smov 128   ;;  %s796_s25 = smov 8  }
  0x2b   : > { %579 = dma.hbm_to_vmem [thread:$0]  (!%p895_p11), %s1066_s3, 512, %s208_s7, [#allocation6], %s795_s24, %s795_s24, %s796_s25  }
  0x2c   : > { %p36_p1 = scmp.ge.s32.totalorder %s34_s9, 2  ;;  %s41_s11 = sadd.s32 1, %s780_s20 }
  0x2d   : > { %p48_p2 = scmp.ne.s32.totalorder %s780_s20, %s776_s19  ;;  %p49_p4 = scmp.eq.s32.totalorder %s792_s23, 0 }
  0x2e   : > { %s1094_s9 = smov (%p36_p1, %s34_s9), 0  ;;  %p1080_p8 = scmp.ne.s32.totalorder %s1074_s27, 0 }
  0x2f   : > { %p922_p6 = por %p49_p4, %p48_p2  ;;  %s38_s8 = ssub.s32 %s788_s22, %s1094_s9 }
  0x30   : > { %p928_p10 = por %p1080_p8, %p48_p2  ;;  %p589_p12 = scmp.lt.s32.totalorder %s792_s23, 2 }
  0x31   : > { %p39_p11 = scmp.eq.s32.totalorder %s38_s8, 0  ;;  %s227_s7 = sand.u32 1, %s780_s20  }
  0x32   : > { %s532_s14 = sshll.u32 %s227_s7, 3  ;;  %s533_s16 = sshll.u32 %s788_s22, 7 }
  0x33   : > { %s937_s15 = scalar_select %p39_p11, %s780_s20, %s41_s11  }
  0x34   : > { %s943_s25 = scalar_lea.hbm %s1063_s0, %s533_s16  ;;  %s231_s27 = scalar_lea.vmem [#allocation2], %s532_s14 }
  0x35   : > { %s238_s6 = sshll.u32 %s231_s27, 4  ;;  %p949_p13 = pnand %p589_p12, %p922_p6  ;;  %s945_s6 = int_to_ptr.vmem [resolvable:$true] %s238_s6 }
  0x36   : > { %s228_s11 = scalar_lea.sflag [#allocation3], %s227_s7  ;;  %s676_s8 = scalar_lea.hbm %s943_s25, 128 }
  0x37   : > { %p677_p0 = scmp.ne.s32.totalorder %s943_s25, %s676_s8  ;;  %p678_p3 = pneg %p949_p13 }
  0x38   : > { %s681_s17 = scalar_lea.hbm %s1063_s0, 256  ;;  %p682_p9 = scmp.lt.u32.totalorder %s943_s25, %s1063_s0 }
  0x39   : > { %p679_p5 = pnand %p678_p3, %p677_p0  ;;  %p683_p1 = scmp.lt.u32.totalorder %s681_s17, %s676_s8 }
  0x3a   : > { %p685_p4 = scmp.lt.u32.totalorder %s676_s8, %s943_s25 }
  0x3b   : > { %p680_p7 = pneg %p679_p5  ;;  %p684_p2 = por %p683_p1, %p682_p9 }
  0x3d   : > { %p686_p6 = por %p685_p4, %p684_p2 }
  0x3f   : > { %p687_p8 = pnand %p686_p6, %p680_p7 }
  0x41   : > { %690 = shalt.err (!%p687_p8)
}
  0x42   : > { %s691_s7 = scalar_lea.vmem %s945_s6, 128  ;;  %s797_s27 = smov [#allocation2]  }
  0x43   : > { %p692_p12 = scmp.ne.s32.totalorder %s945_s6, %s691_s7  ;;  %s696_s14 = sshll.u32 %s797_s27, 4  ;;  %s697_s14 = int_to_ptr.vmem [resolvable:$false] %s696_s14 }
  0x44   : > { %s698_s16 = scalar_lea.vmem %s697_s14, 256  ;;  %p699_p5 = scmp.lt.s32.totalorder %s945_s6, %s697_s14 }
  0x45   : > { %p694_p11 = pnand %p692_p12, %p678_p3  ;;  %p700_p9 = scmp.lt.s32.totalorder %s698_s16, %s691_s7 }
  0x47   : > { %p695_p0 = pneg %p694_p11  ;;  %p701_p1 = por %p700_p9, %p699_p5 }
  0x49   : > { %p702_p2 = pnand %p701_p1, %p695_p0 }
  0x4b   : > { %705 = shalt.err (!%p702_p2)
}
  0x4c   : > { %583 = dma.hbm_to_vmem [thread:$0]  (!%p949_p13), %s943_s25, 128, %s945_s6, %s228_s11  }
  0x4d   : > { %p1083_p7 = scmp.ne.s32.totalorder %s1077_s30, 0 }
  0x4e   : > { %s981_s8 = sand.u32 (!%p1083_p7), 1, %s776_s19   ;;  %p1084_p3 = scmp.ne.s32.totalorder (!%p1083_p7), %s1075_s28, 0 }
  0x4f   : > { %247 = sbr.rel (%p1083_p7) target bundleno = 634 (0x27a), region = 40  ;;  %s535_s17 = sshll.u32 (!%p1083_p7), %s981_s8, 3 }
  0x50   : > { %s250_s12 = scalar_lea.sflag (!%p1083_p7), [#allocation3], %s981_s8  ;;  %s253_s24 = scalar_lea.vmem (!%p1083_p7), [#allocation2], %s535_s17 }
  0x56   : > { %759 = dma.done.wait (%p1084_p3), %s250_s12, 128  }
  0x57   : > { %761 = vsyncadd (%p1084_p3), %s250_s12, 4294967168  ;;  %p1085_p13 = scmp.ne.s32.totalorder %s1073_s26, 0 }
  0x59   : > { %763 = dma.done.wait (%p1085_p13), [#allocation6], 512  }
  0x5a   : > { %765 = vsyncadd (%p1085_p13), [#allocation6], 4294966784  ;;  %vm291_vm0 = vcmask 261120   ;;  %v290_v0 = vld [vmem:[%s253_s24] sm:$0xff]  ;;  %v322_v7 = vld [vmem:[#allocation5] sm:$0xff]  ;;  %v798_v10 = vmov 0.0|0.0  }
  0x5b   : > { %v292_v1 = vsel %vm291_vm0, %v290_v0, 0.0  ;;  %v323_v8 = vld [vmem:[#allocation5 + $0x8] sm:$0xff]  ;;  %v324_v9 = vld [vmem:[#allocation5 + $0x10] sm:$0xff]  ;;  %562 = vmatprep.subr.bf16.mxu0 %v798_v10  ;;  %v325_v12 = vld [vmem:[#allocation5 + $0x18] sm:$0xff]  ;;  %vm799_vm1 = vmmov 0   ;;  %v800_v13 = vmov 0.0  }
  0x5c   : > { %293 = vadd.xlane.f32.xlu0 %v292_v1  ;;  %v563_v11 = vpack.c.bf16 %v323_v8, %v322_v7  ;;  %559 = vmatprep.mubr.msk.f32.mxu0 %vm799_vm1, %v800_v13  ;;  %v566_v14 = vpack.c.bf16 %v325_v12, %v324_v9  ;;  %v538_v19 = vld [vmem:[%s1064_s1] ss:$0 sm:$0xff]  ;;  %s543_s11 = sshll.u32 %s784_s21, 7  ;;  %s286_s7 = scalar_lea.vmem [#allocation7], %s535_s17 }
  0x5d   : > { %v539_v21 = vld [vmem:[%s1065_s2] ss:$0 sm:$0xff]  ;;  %s423_s27 = sshll.u32 %s286_s7, 4  ;;  %s1013_s12 = scalar_lea.hbm %s1068_s5, %s543_s11  ;;  %s1015_s27 = int_to_ptr.vmem [resolvable:$true] %s423_s27 }
  0x5e   : > { %564 = vmatpush3.bf16.msra.mxu0 %v563_v11  ;;  %v540_v24 = vld [vmem:[%s1067_s4] ss:$0 sm:$0xff]  ;;  %s409_s24 = scalar_lea.sflag [#allocation4], %s981_s8  ;;  %s706_s21 = scalar_lea.vmem %s1015_s27, 128 }
  0x5f   : > { %565 = vmatprep.subr.bf16.mxu0 %v798_v10  ;;  %p707_p4 = scmp.ne.s32.totalorder %s1015_s27, %s706_s21  ;;  %s801_s17 = smov [#allocation7]  }
  0x60   : > { %s710_s26 = sshll.u32 %s801_s17, 4  ;;  %s711_s26 = int_to_ptr.vmem [resolvable:$false] %s710_s26 }
  0x61   : > { %p708_p6 = pnand %p707_p4, %p928_p10  ;;  %s712_s28 = scalar_lea.vmem %s711_s26, 256 }
  0x62   : > { %567 = vmatpush3.bf16.msra.mxu0 %v566_v14  ;;  %p713_p12 = scmp.lt.s32.totalorder %s1015_s27, %s711_s26  ;;  %p714_p11 = scmp.lt.s32.totalorder %s712_s28, %s706_s21 }
  0x63   : > { %p709_p8 = pneg %p708_p6 }
  0x64   : > { %p715_p0 = por %p714_p11, %p713_p12 }
  0x66   : > { %p716_p5 = pnand %p715_p0, %p709_p8 }
  0xe9   : > { %v294_v2 = vpop.xlane.xlu0 %293 }
  0xea   : > { %v296_v3 = vmul.f32 0.03125, %v294_v2 }
  0xec   : > { %v297_v4 = vsub.f32 %v290_v0, %v296_v3 }
  0xee   : > { %v298_v5 = vmul.f32 %v297_v4, %v297_v4 }
  0xf0   : > { %v299_v6 = vsel %vm291_vm0, %v298_v5, 0.0 }
  0xf1   : > { %300 = vadd.xlane.f32.xlu0 %v299_v6 }
 0x17e   : > { %v301_v15 = vpop.xlane.xlu0 %300 }
 0x17f   : > { %v302_v16 = vmul.f32 0.03125, %v301_v15 }
 0x181   : > { %v303_v17 = vadd.f32 1e-05, %v302_v16 }
 0x183   : > { %646 = vrsqrt.f32 %v303_v17 }
 0x18d   : > { %v647_v18 = vpop.eup %646 }
 0x18e   : > { %v305_v20 = vmul.f32 %v647_v18, %v297_v4 }
 0x190   : > { %v313_v22 = vmul.f32 %v538_v19, %v305_v20 }
 0x192   : > { %v321_v23 = vadd.f32 %v539_v21, %v313_v22 }
 0x194   : > { %560 = vmatmul.mubr.msk.f32.vlgmr.msra.gmra.mrb[0].mxu0 %vm291_vm0, %v321_v23 }
 0x267   : > { %v402_v25 = vpop.f32.mrb[0].mxu0 }
 0x268   : > { %v403_v26 = vadd.f32 %v540_v24, %v402_v25  ;;  %v561_v27 = vpop.f32.mrb[1].mxu0 }
 0x26a   : > { %v406_v28 = vmax.f32 %v403_v26, 0.0 }
 0x26c   : > { %407 = vst.msk [vmem:[%s286_s7] sm:$0xff] %vm291_vm0, %v406_v28 }
 0x26d   : > { %719 = shalt.err (!%p716_p5)
}
 0x26e   : > { %s720_s8 = scalar_lea.hbm %s1013_s12, 128  ;;  %s724_s6 = scalar_lea.hbm %s1068_s5, 256 }
 0x26f   : > { %p721_p9 = scmp.ne.s32.totalorder %s1013_s12, %s720_s8  ;;  %p725_p7 = scmp.lt.u32.totalorder %s1013_s12, %s1068_s5 }
 0x270   : > { %p726_p3 = scmp.lt.u32.totalorder %s724_s6, %s720_s8  ;;  %p728_p4 = scmp.lt.u32.totalorder %s720_s8, %s1013_s12 }
 0x271   : > { %p722_p1 = pnand %p721_p9, %p928_p10 }
 0x272   : > { %p727_p13 = por %p726_p3, %p725_p7 }
 0x273   : > { %p723_p2 = pneg %p722_p1 }
 0x274   : > { %p729_p6 = por %p728_p4, %p727_p13 }
 0x276   : > { %p730_p8 = pnand %p729_p6, %p723_p2 }
 0x278   : > { %733 = shalt.err (!%p730_p8)
}
 0x279   : > { %574 = dma.vmem_to_hbm [thread:$0]  (%p928_p10), %s1015_s27, 128, %s1013_s12, %s409_s24  }
 0x27a PF: > { %s435_s7 = sand.u32 1, %s772_s18   ;;  %p1086_p12 = scmp.ne.s32.totalorder %s1076_s29, 0 }
 0x27b   : > { %p1087_p11 = scmp.ge.s32.totalorder %s792_s23, 2  ;;  %s436_s14 = scalar_lea.sflag [#allocation4], %s435_s7 }
 0x27d   : > { %p585_p0 = pnand %p1087_p11, %p1086_p12 }
 0x27f   : > { %767 = dma.done.wait (!%p585_p0), %s436_s14, 128  }
 0x280   : > { %769 = vsyncadd (!%p585_p0), %s436_s14, 4294967168  ;;  %s22_s23 = sadd.s32 1, %s792_s23   ;;  %s1088_s18 = smov %s776_s19 }
 0x281   : > { %p19_p5 = scmp.ge.s32.totalorder %s22_s23, 4   ;;  %s1089_s19 = smov %s780_s20 }
 0x282   : > { %s1090_s20 = smov %s937_s15  ;;  %s1091_s21 = smov %s788_s22 }
 0x283   : > { %s1092_s22 = smov %s1094_s9  ;;  %21 = sbr.rel (!%p19_p5) target bundleno = 7 (0x7), region = 93 }
 0x28a   :  { %441 = vsyncpa [#allocation3], 1 }
 0x28b   :  { %443 = vsyncpa [#allocation3 + $0x1], 1 }
 0x28c   :  { %444 = vsyncpa [#allocation6], 1 }
 0x28d   :  { %445 = vsyncpa [#allocation4], 1 }
 0x28e   :  { %447 = vsyncpa [#allocation4 + $0x1], 1 }

</bundles_post_ra>
